<compile_context>
chip_gen: v5e
topology: v5e:2x2
jax: 0.10.0
libtpu: 0.0.40
codegen_flags: <defaults>
</compile_context>

<pallas_src>
import functools

import jax
import jax.numpy as jnp
import numpy as np
from jax.experimental import pallas as pl
from jax.experimental.pallas import tpu as pltpu


# --------------------------------- helpers ---------------------------------- #

def _round_up(x, m):
    return ((x + m - 1) // m) * m


def _vmem_limit(est_bytes):
    # generous headroom above the estimated double-buffered working set,
    # capped at 64 MiB so the limit is valid on v7x (64 MiB VMEM / TC) as well.
    return int(min(max(2 * est_bytes, 32 << 20), 64 << 20))


def _pick_tiles(N, E):
    """Tile sizes + padded extents.

    - node tile: 256 when N > 256 so the "parallel" axis has >=2 tiles (v7x megacore),
    - edge tile: 512 (multiple of 256 for the 2x256^2 MXUs on v6e/v7x, and of 128 so the
      DT lane dim stays aligned) when E > 1024, else one full tile.
    """
    if N <= 256:
        nt = _round_up(max(N, 8), 8)
        N_pad = nt
    else:
        nt = 256
        N_pad = _round_up(N, nt)
    if E <= 1024:
        et = _round_up(max(E, 8), 8)
        E_pad = et
    else:
        et = 512
        E_pad = _round_up(E, et)
    return nt, et, N_pad, E_pad


# ------------------------ kernel A: per-edge messages ------------------------ #

def _message_kernel(s_ref, h_ref, t_ref, w_ref, msg_ref, *, num_rels, compute_dtype):
    """grid = (edge_tiles,) ["parallel"].  Messages computed exactly once per edge.

        hs     = S_e @ H                               (one-hot gather of src features)
        hs_rep = [hs*T[:,0] | hs*T[:,1] | ...]         (relation select fused into VPU copy)
        msg    = hs_rep @ W_stack                      (all relations in ONE MXU call)
    """
    # (Et, N) @ (N, I) -> (Et, I), f32 accumulation; one-hot rows -> exact selection.
    hs = jnp.dot(s_ref[...], h_ref[...], preferred_element_type=jnp.float32)

    # Relation-select / edge-dropout mask, applied to the small per-edge operand.
    # Masking stays f32 (v5e has no bf16 VALU); the 0/1 mask itself is exact in bf16.
    t = t_ref[...].astype(jnp.float32)                              # (Et, R)
    parts = [hs * t[:, r:r + 1] for r in range(num_rels)]           # R x (Et, I)
    hs_rep = jnp.concatenate(parts, axis=-1).astype(compute_dtype)  # (Et, R*I)

    # (Et, R*I) @ (R*I, O_pad) -> (Et, O_pad), single deep-contraction MXU call.
    msg_ref[...] = jnp.dot(hs_rep, w_ref[...],
                           preferred_element_type=jnp.float32).astype(msg_ref.dtype)


# -------------------- kernel B: scatter-sum + activation --------------------- #

def _scatter_kernel(dt_ref, msg_ref, out_ref, *, activation):
    """grid = (node tiles "parallel", edge tiles "arbitrary" reduction).

        out += DT_{n,e} @ msg_e      (f32 accumulation directly in the resident out block)
    """
    e = pl.program_id(1)

    @pl.when(e == 0)
    def _init():
        out_ref[...] = jnp.zeros_like(out_ref)

    out_ref[...] += jnp.dot(dt_ref[...], msg_ref[...],
                            preferred_element_type=jnp.float32)

    if activation is not None:
        @pl.when(e == pl.num_programs(1) - 1)
        def _finalize():
            out_ref[...] = activation(out_ref[...])


# ------------------------------- forward pass -------------------------------- #

def rgcn_forward(h, S, DT, T, w_stack, node_tile, edge_tile, *, activation,
                 compute_dtype=jnp.bfloat16):
    N_pad, I = h.shape
    E_pad, R = T.shape
    RI, O_pad = w_stack.shape
    nt, et = node_tile, edge_tile
    assert N_pad % nt == 0 and E_pad % et == 0
    isz = jnp.dtype(compute_dtype).itemsize

    # ---- pass 1: per-edge messages (edge-parallel, computed once) ----
    msg_vmem = (et * N_pad + N_pad * I + et * max(R, 128) + RI * O_pad + et * O_pad) * isz
    ce_msg = pl.CostEstimate(
        flops=2 * E_pad * (N_pad * I + RI * O_pad),
        transcendentals=0,
        bytes_accessed=(E_pad * N_pad + N_pad * I + E_pad * R + RI * O_pad
                        + E_pad * O_pad) * isz)
    msg = pl.pallas_call(
        functools.partial(_message_kernel, num_rels=R, compute_dtype=compute_dtype),
        out_shape=jax.ShapeDtypeStruct((E_pad, O_pad), compute_dtype),
        grid=(E_pad // et,),
        in_specs=[
            pl.BlockSpec((et, N_pad), lambda e: (e, 0)),    # S   (one-hot gather rows)
            pl.BlockSpec((N_pad, I), lambda e: (0, 0)),     # H   (resident features)
            pl.BlockSpec((et, R), lambda e: (e, 0)),        # T   (relation mask, (E,R) bf16)
            pl.BlockSpec((RI, O_pad), lambda e: (0, 0)),    # W_stack (precomputed, resident)
        ],
        out_specs=pl.BlockSpec((et, O_pad), lambda e: (e, 0)),
        compiler_params=pltpu.CompilerParams(
            dimension_semantics=("parallel",),
            vmem_limit_bytes=_vmem_limit(msg_vmem)),
        cost_estimate=ce_msg,
    )(S, h, T, w_stack)

    # ---- pass 2: scatter-sum into destination nodes + activation ----
    scat_vmem = (nt * et + et * O_pad) * isz + nt * O_pad * 4
    ce_scat = pl.CostEstimate(
        flops=2 * N_pad * E_pad * O_pad,
        transcendentals=0,
        bytes_accessed=(N_pad * E_pad + E_pad * O_pad) * isz + N_pad * O_pad * 4)
    out = pl.pallas_call(
        functools.partial(_scatter_kernel, activation=activation),
        out_shape=jax.ShapeDtypeStruct((N_pad, O_pad), jnp.float32),
        grid=(N_pad // nt, E_pad // et),
        in_specs=[
            pl.BlockSpec((nt, et), lambda n, e: (n, e)),     # DT  (one-hot scatter)
            pl.BlockSpec((et, O_pad), lambda n, e: (e, 0)),  # msg
        ],
        out_specs=pl.BlockSpec((nt, O_pad), lambda n, e: (n, 0)),
        compiler_params=pltpu.CompilerParams(
            dimension_semantics=("parallel", "arbitrary"),
            vmem_limit_bytes=_vmem_limit(scat_vmem)),
        cost_estimate=ce_scat,
    )(DT, msg)
    return out


# ------------------------------ module wrapper ------------------------------- #

def _xavier_uniform(key, shape, gain):
    # matches torch.nn.init.xavier_uniform_ fan computation
    if len(shape) > 2:
        rf = int(np.prod(shape[2:]))
        fan_in, fan_out = shape[1] * rf, shape[0] * rf
    else:
        fan_in, fan_out = shape[1], shape[0]
    bound = gain * float(np.sqrt(6.0 / (fan_in + fan_out)))
    return jax.random.uniform(key, shape, jnp.float32, -bound, bound)


class TPRGCNLayerPallas:
    """bias=None, dropout=0, edge_dropout=Identity, sum aggregator."""

    def __init__(self, inp_dim, out_dim, num_rels, is_input_layer,
                 num_bases=-1, activation=None, key=jax.random.PRNGKey(0)):
        self.inp_dim, self.out_dim, self.num_rels = inp_dim, out_dim, num_rels
        self.num_bases = num_rels if (num_bases <= 0 or num_bases > num_rels) else num_bases
        self.is_input_layer = is_input_layer
        self.activation = activation
        gain = float(np.sqrt(2.0))  # calculate_gain('relu')
        k1, k2 = jax.random.split(key)
        self.weight = _xavier_uniform(k1, (self.num_bases, inp_dim, out_dim), gain)
        self.w_comp = _xavier_uniform(k2, (num_rels, self.num_bases), gain)

    def __call__(self, h, src, dst, etype, prev_repr=None):
        N, I = h.shape
        E = src.shape[0]
        R, O = self.num_rels, self.out_dim
        O_pad = _round_up(O, 128)   # lane-dense output slab (TODO(synk): 256 on v6e/v7x for large O)
        cdt = jnp.bfloat16          # MXU operand dtype; all dots accumulate in f32

        nt, et, N_pad, E_pad = _pick_tiles(N, E)

        # Padded dense edge encodings (0/1 values -> exact in bf16). Padded edges get
        # sentinel index -1 so their S/DT/T rows are all-zero (no spurious contributions).
        pad_e = E_pad - E
        e_valid = jnp.arange(E_pad) < E
        src_p = jnp.where(e_valid, jnp.pad(src, (0, pad_e)), -1)
        dst_p = jnp.where(e_valid, jnp.pad(dst, (0, pad_e)), -1)
        typ_p = jnp.where(e_valid, jnp.pad(etype, (0, pad_e)), -1)

        n_idx = jnp.arange(N_pad)
        S = (src_p[:, None] == n_idx[None, :]).astype(cdt)          # (E_pad, N_pad) gather
        DT = (n_idx[:, None] == dst_p[None, :]).astype(cdt)         # (N_pad, E_pad) scatter (built directly)
        drop = jnp.ones((E_pad, 1), jnp.float32)                    # Identity edge-dropout
        T = ((typ_p[:, None] == jnp.arange(R)[None, :]).astype(jnp.float32) * drop).astype(cdt)

        h_p = jnp.zeros((N_pad, I), cdt).at[:N].set(h.astype(cdt))

        # Basis decomposition hoisted out of the kernel (exact f32 einsum, one bf16 cast):
        #   W_stack[r*I + i, o] = sum_b w_comp[r, b] * weight[b, i, o]
        w_rel = jnp.einsum('rb,bio->rio', self.w_comp, self.weight)             # (R, I, O)
        w_stack = jnp.zeros((R * I, O_pad), jnp.float32).at[:, :O].set(
            w_rel.reshape(R * I, O)).astype(cdt)                                # (R*I, O_pad)

        out = rgcn_forward(h_p, S, DT, T, w_stack, nt, et,
                           activation=self.activation, compute_dtype=cdt)
        h_new = out[:N, :O]

        if self.is_input_layer:
            repr_new = h_new[:, None, :]
        else:
            repr_new = jnp.concatenate([prev_repr, h_new[:, None, :]], axis=1)
        return h_new, repr_new


# ----------------------------------- main ------------------------------------ #

if __name__ == "__main__":
    N, E = 8, 16          # nodes, edges
    INP, OUT = 8, 16      # inp_dim, out_dim
    R, B = 4, 2           # num_rels, num_bases

    key = jax.random.PRNGKey(0)
    k_h, k_src, k_type, k_param = jax.random.split(key, 4)

    h = jax.random.normal(k_h, (N, INP), jnp.float32)
    src = jax.random.randint(k_src, (E,), 0, N, jnp.int32)
    dst = jnp.arange(E, dtype=jnp.int32) % N          # every node has an in-edge
    etype = jax.random.randint(k_type, (E,), 0, R, jnp.int32)

    layer = TPRGCNLayerPallas(INP, OUT, R, is_input_layer=True,
                              num_bases=B, activation=jax.nn.relu, key=k_param)

    h_new, node_repr = layer(h, src, dst, etype)
    jax.block_until_ready((h_new, node_repr))

    # pure-JAX f32 reference; kernel uses bf16 MXU operands -> loosened tolerance
    w_rel_ref = jnp.einsum('rb,bio->rio', layer.w_comp, layer.weight)
    msg_ref = jnp.einsum('ei,eio->eo', h[src], w_rel_ref[etype])
    h_ref = jnp.zeros((N, OUT), jnp.float32).at[dst].add(msg_ref)
    h_ref = jax.nn.relu(h_ref)
    np.testing.assert_allclose(np.asarray(h_new), np.asarray(h_ref), rtol=2e-2, atol=2e-2)
    assert node_repr.shape == (N, 1, OUT)

    print("KERNEL_OK")
</pallas_src>

<mosaic_0001>
module attributes {stable_mosaic.version = 11 : i64} {
  func.func @_message_kernel(%arg0: i32, %arg1: memref<16x8xbf16, #tpu.memory_space<vmem>>, %arg2: memref<8x8xbf16, #tpu.memory_space<vmem>>, %arg3: memref<16x4xbf16, #tpu.memory_space<vmem>>, %arg4: memref<32x128xbf16, #tpu.memory_space<vmem>>, %arg5: memref<16x128xbf16, #tpu.memory_space<vmem>>) attributes {dimension_semantics = [#tpu.dimension_semantics<parallel>], iteration_bounds = array<i64: 1>, scalar_prefetch = 0 : i64, scratch_operands = 0 : i64, tpu.core_type = #tpu.core_type<tc>, window_params = [{transform_indices = @transform_0, window_bounds = array<i64: 16, 8>}, {pipeline_mode = #tpu.pipeline_mode<synchronous>, transform_indices = @transform_1, window_bounds = array<i64: 8, 8>}, {transform_indices = @transform_2, window_bounds = array<i64: 16, 4>}, {pipeline_mode = #tpu.pipeline_mode<synchronous>, transform_indices = @transform_3, window_bounds = array<i64: 32, 128>}, {transform_indices = @transform_4, window_bounds = array<i64: 16, 128>}]} {
    %c0 = arith.constant 0 : index
    %c0_0 = arith.constant 0 : index
    %0 = vector.load %arg1[%c0, %c0_0] : memref<16x8xbf16, #tpu.memory_space<vmem>>, vector<16x8xbf16>
    %c0_1 = arith.constant 0 : index
    %c0_2 = arith.constant 0 : index
    %1 = vector.load %arg2[%c0_1, %c0_2] : memref<8x8xbf16, #tpu.memory_space<vmem>>, vector<8x8xbf16>
    %cst = arith.constant dense<0.000000e+00> : vector<16x8xf32>
    %2 = tpu.matmul %0, %1, %cst {dimension_numbers = #tpu.dot_dimension_numbers<[1], [0], [0], [1], [0, 0, 1, 1], [], []>} : vector<16x8xbf16>, vector<8x8xbf16>, vector<16x8xf32> -> vector<16x8xf32>
    %c0_3 = arith.constant 0 : index
    %c0_4 = arith.constant 0 : index
    %3 = vector.load %arg3[%c0_3, %c0_4] : memref<16x4xbf16, #tpu.memory_space<vmem>>, vector<16x4xbf16>
    %4 = arith.extf %3 : vector<16x4xbf16> to vector<16x4xf32>
    %5 = vector.extract_strided_slice %4 {offsets = [0, 0], sizes = [16, 1], strides = [1, 1]} : vector<16x4xf32> to vector<16x1xf32>
    %6 = vector.broadcast %5 : vector<16x1xf32> to vector<16x8xf32>
    %7 = arith.mulf %2, %6 : vector<16x8xf32>
    %8 = vector.extract_strided_slice %4 {offsets = [0, 1], sizes = [16, 1], strides = [1, 1]} : vector<16x4xf32> to vector<16x1xf32>
    %9 = vector.broadcast %8 : vector<16x1xf32> to vector<16x8xf32>
    %10 = arith.mulf %2, %9 : vector<16x8xf32>
    %11 = vector.extract_strided_slice %4 {offsets = [0, 2], sizes = [16, 1], strides = [1, 1]} : vector<16x4xf32> to vector<16x1xf32>
    %12 = vector.broadcast %11 : vector<16x1xf32> to vector<16x8xf32>
    %13 = arith.mulf %2, %12 : vector<16x8xf32>
    %14 = vector.extract_strided_slice %4 {offsets = [0, 3], sizes = [16, 1], strides = [1, 1]} : vector<16x4xf32> to vector<16x1xf32>
    %15 = vector.broadcast %14 : vector<16x1xf32> to vector<16x8xf32>
    %16 = arith.mulf %2, %15 : vector<16x8xf32>
    %17 = tpu.concatenate %7, %10, %13, %16 in 1 : vector<16x8xf32>, vector<16x8xf32>, vector<16x8xf32>, vector<16x8xf32> -> vector<16x32xf32>
    %18 = arith.truncf %17 : vector<16x32xf32> to vector<16x32xbf16>
    %c0_5 = arith.constant 0 : index
    %c0_6 = arith.constant 0 : index
    %19 = vector.load %arg4[%c0_5, %c0_6] : memref<32x128xbf16, #tpu.memory_space<vmem>>, vector<32x128xbf16>
    %cst_7 = arith.constant dense<0.000000e+00> : vector<16x128xf32>
    %20 = tpu.matmul %18, %19, %cst_7 {dimension_numbers = #tpu.dot_dimension_numbers<[1], [0], [0], [1], [0, 0, 1, 1], [], []>} : vector<16x32xbf16>, vector<32x128xbf16>, vector<16x128xf32> -> vector<16x128xf32>
    %21 = arith.truncf %20 : vector<16x128xf32> to vector<16x128xbf16>
    %c0_8 = arith.constant 0 : index
    %c0_9 = arith.constant 0 : index
    %22 = vector.load %arg5[%c0_8, %c0_9] : memref<16x128xbf16, #tpu.memory_space<vmem>>, vector<16x128xbf16>
    tpu.vector_store %arg5[%c0_8, %c0_9], %21 {strides = array<i32>} : memref<16x128xbf16, #tpu.memory_space<vmem>>, vector<16x128xbf16>,
    return
  }
  func.func @transform_0(%arg0: i32) -> (i32, i32) {
    %c0_i32 = arith.constant 0 : i32
    %c0_i32_0 = arith.constant 0 : i32
    return %arg0, %c0_i32 : i32, i32
  }
  func.func @transform_1(%arg0: i32) -> (i32, i32) {
    %c0_i32 = arith.constant 0 : i32
    %c0_i32_0 = arith.constant 0 : i32
    %c0_i32_1 = arith.constant 0 : i32
    return %c0_i32, %c0_i32_0 : i32, i32
  }
  func.func @transform_2(%arg0: i32) -> (i32, i32) {
    %c0_i32 = arith.constant 0 : i32
    %c0_i32_0 = arith.constant 0 : i32
    return %arg0, %c0_i32 : i32, i32
  }
  func.func @transform_3(%arg0: i32) -> (i32, i32) {
    %c0_i32 = arith.constant 0 : i32
    %c0_i32_0 = arith.constant 0 : i32
    %c0_i32_1 = arith.constant 0 : i32
    return %c0_i32, %c0_i32_0 : i32, i32
  }
  func.func @transform_4(%arg0: i32) -> (i32, i32) {
    %c0_i32 = arith.constant 0 : i32
    %c0_i32_0 = arith.constant 0 : i32
    return %arg0, %c0_i32 : i32, i32
  }
}

</mosaic_0001>

<bundles_post_ra>
// kernel: tpu_custom_call.1
= control target key start
LH: loop header
LB: loop body
LE: loop exit
PB: predicated region body
PF: predicated region fallthrough
CT: control target
= control target key end

     0   :  { %vm31_vm0 = vcmask 1043456   ;;  %v286_v3 = vmov 3   ;;  %v287_v4 = vmov 1   ;;  %s342_s0 = inlined_call_operand.vmem [shape: bf16[16,8], index: 0, kind: input, shape index: {}]   ;;  %s343_s1 = inlined_call_operand.vmem [shape: bf16[8,8], index: 1, kind: input, shape index: {}]   ;;  %s344_s2 = inlined_call_operand.vmem [shape: bf16[16,4], index: 2, kind: input, shape index: {}]   ;;  %s345_s3 = inlined_call_operand.vmem [shape: bf16[32,128], index: 3, kind: input, shape index: {}]   ;;  %s346_s4 = inlined_call_operand.hbm [shape: bf16[16,128], index: 4, kind: output, shape index: {}]  }
   0x1   :  { %v21_v0 = vld [vmem:[%s343_s1] sm:$0xf]  ;;  %232 = vset.pattern.permute.xlu1 %v286_v3  ;;  %220 = vset.pattern.permute.xlu0 %v287_v4 }
   0x2   :  { %v202_v1 = vld [vmem:[%s344_s2] sm:$0xff]   ;;  %v33_v2 = vsel %vm31_vm0, %v21_v0, 0 }
   0x3   :  { %v203_v5 = vunpack.c.l.bf16 %v202_v1  ;;  %v204_v6 = vunpack.c.h.bf16 %v202_v1 }
   0x4   :  { %9 = vsyncpa [#allocation3], 0  ;;  %42 = vmatpush.bf16.msra.mxu0 %v33_v2  ;;  %v198_v7 = vld [vmem:[%s342_s0] sm:$0xff]  ;;  %vm27_vm1 = vcmask 64512   ;;  %v288_v9 = vmov 0   ;;  %v289_v10 = vmov 2  }
   0x5   :  { %v233_v8 = vpack.i.bf16 %v204_v6, %v203_v5  ;;  %s290_s0 = smov 24   ;;  %s291_s1 = smov 8   ;;  %v200_v31 = vld [vmem:[%s345_s3 + $0x8] sm:$0xff]  ;;  %v199_v32 = vld [vmem:[%s345_s3] sm:$0xff]  ;;  %vm121_vm2 = vcmask 130048   ;;  %vm124_vm3 = vcmask 195584  }
   0x6   :  { %s292_s2 = smov 16   ;;  %154 = vmatpush.bf16.msra.mxu1 %v200_v31  ;;  %vm144_vm4 = vcmask 261120   ;;  %s293_s3 = smov [#allocation2]  }
   0x7   :  { %234 = vperm.xlu1 %232, %v233_v8   ;;  %222 = vperm.xlu0 %220, %v233_v8   ;;  %s170_s25 = sshll.u32 %s293_s3, 4  ;;  %s172_s28 = sshll.u32 %s346_s4, 4  ;;  %s171_s25 = int_to_ptr.vmem [resolvable:$true] %s170_s25  ;;  %s173_s28 = int_to_ptr.hbm [resolvable:$true] %s172_s28 }
   0x8   :  { %188 = vmatmul.msk.bf16.vlgmr.msra.gmra.mxu0 %vm27_vm1, %v198_v7  ;;  %s294_s29 = smov 64   ;;  %s295_s30 = smov 4  }
   0xa   :  { %155 = vmatpush.bf16.msra.mxu1 %v199_v32 }
   0xf   :  { %238 = vset.pattern.permute.xlu1 %v288_v9  ;;  %226 = vset.pattern.permute.xlu0 %v289_v10 }
  0x10   :  { %240 = vperm.xlu1 %238, %v233_v8   ;;  %228 = vperm.xlu0 %226, %v233_v8  }
  0x18   :  { %259 = vset.pattern.permute.xlu0 %v286_v3 }
  0x79   :  { %v223_v11 = vpop.permute.xlu0 %222  ;;  %v235_v13 = vpop.permute.xlu1 %234 }
  0x7a   :  { %v237_v14 = vunpack.i.h.bf16 %v235_v13  ;;  %v236_v15 = vunpack.i.l.bf16 %v235_v13  ;;  %v225_v16 = vunpack.i.h.bf16 %v223_v11  ;;  %v224_v17 = vunpack.i.l.bf16 %v223_v11 }
  0x82   :  { %v229_v23 = vpop.permute.xlu0 %228  ;;  %v241_v34 = vpop.permute.xlu1 %240 }
  0x83   :  { %v231_v24 = vunpack.i.h.bf16 %v229_v23  ;;  %v230_v27 = vunpack.i.l.bf16 %v229_v23  ;;  %v243_v35 = vunpack.i.h.bf16 %v241_v34  ;;  %v242_v36 = vunpack.i.l.bf16 %v241_v34 }
  0x85   :  { %v44_v12 = vpop.f32.mrf.mxu0 }
  0x86   :  { %v93_v19 = vmul.f32 %v236_v15, %v44_v12  ;;  %v73_v21 = vmul.f32 %v224_v17, %v44_v12  ;;  %v83_v29 = vmul.f32 %v230_v27, %v44_v12  ;;  %v63_v42 = vmul.f32 %v242_v36, %v44_v12 }
  0x8d   :  { %v46_v18 = vpop.f32.mrf.mxu0 }
  0x8e   :  { %v94_v20 = vmul.f32 %v237_v14, %v46_v18  ;;  %v74_v22 = vmul.f32 %v225_v16, %v46_v18  ;;  %v84_v28 = vmul.f32 %v231_v24, %v46_v18  ;;  %v64_v43 = vmul.f32 %v243_v35, %v46_v18 }
  0x90   :  { %v254_v25 = vpack.i.bf16 %v94_v20, %v93_v19  ;;  %v244_v26 = vpack.i.bf16 %v74_v22, %v73_v21  ;;  %v249_v30 = vpack.i.bf16 %v84_v28, %v83_v29 }
  0x92   :  { %255 = vrot.lane.b32.xlu1 %v254_v25, %s290_s0  ;;  %245 = vrot.lane.b32.xlu2 %v244_v26, %s291_s1 }
  0x9a   :  { %250 = vrot.lane.b32.xlu2 %v249_v30, %s292_s2 }
  0xec   :  { %v246_v33 = vpop.permute.xlu2 %245 }
  0xed   :  { %v248_v38 = vunpack.i.h.bf16 %v246_v33  ;;  %v247_v39 = vunpack.i.l.bf16 %v246_v33 }
  0xef   :  { %v119_v45 = vsel %vm27_vm1, %v63_v42, %v247_v39  ;;  %v120_v46 = vsel %vm27_vm1, %v64_v43, %v248_v38 }
  0xf4   :  { %v251_v37 = vpop.permute.xlu2 %250 }
  0xf5   :  { %v253_v40 = vunpack.i.h.bf16 %v251_v37  ;;  %v252_v41 = vunpack.i.l.bf16 %v251_v37 }
  0xf7   :  { %v122_v49 = vsel %vm121_vm2, %v119_v45, %v252_v41  ;;  %v123_v50 = vsel %vm121_vm2, %v120_v46, %v253_v40 }
 0x104   :  { %v256_v44 = vpop.permute.xlu1 %255 }
 0x105   :  { %v258_v47 = vunpack.i.h.bf16 %v256_v44  ;;  %v257_v48 = vunpack.i.l.bf16 %v256_v44 }
 0x107   :  { %v125_v51 = vsel %vm124_vm3, %v122_v49, %v257_v48  ;;  %v126_v52 = vsel %vm124_vm3, %v123_v50, %v258_v47 }
 0x108   :  { %v127_v53 = vpack.c.bf16 %v126_v52, %v125_v51 }
 0x10a   :  { %197 = vmatmul.msk.bf16.vlgmr.msra.gmra.mxu1 %vm144_vm4, %v127_v53 }
 0x187   :  { %v157_v54 = vpop.f32.mrf.mxu1 }
 0x18f   :  { %v159_v55 = vpop.f32.mrf.mxu1 }
 0x190   :  { %v208_v56 = vpack.c.bf16 %v159_v55, %v157_v54 }
 0x192   :  { %209 = vst [vmem:[#allocation2] sm:$0xff] %v208_v56  }
 0x193   :  { %178 = dma.vmem_to_hbm [thread:$0]  %s171_s25, 128, %s173_s28, [#allocation3], %s294_s29, %s294_s29, %s295_s30  }
 0x194   :  { %284 = dma.done.wait [#allocation3], 128  }
 0x195   :  { %285 = vsyncadd [#allocation3], 4294967168 }
 0x196   :  { %183 = vsyncpa [#allocation3], 1 }

</bundles_post_ra>
